<compile_context>
chip_gen: v7x
topology: tpu7x:2x2x1
jax: 0.10.0
libtpu: 0.0.40
codegen_flags: <defaults>
</compile_context>

<pallas_src>
import functools

import numpy as np
import jax
import jax.numpy as jnp
from jax.experimental import pallas as pl
from jax.experimental.pallas import tpu as pltpu


# --- QDT constants (from QDTConstants) --------------------------------------
GAMMA = 0.4497
ALPHA = 0.52
BETA = 0.31
LAMBDA = 0.867
PHI = 1.618033
KAPPA_0 = 1.0

_LANE = 128           # lane width (last dim)
_BF16_SUBLANE = 16    # bf16 vreg is (16, 128): round batch tiles to 16
_MAX_BATCH_TILE = 1024  # sweepable; VMEM budget shrinks it if needed


def _round_up(x, m):
    return (x + m - 1) // m * m


def _vmem_budget_bytes():
    """~75% of this chip's VMEM (48 MiB on v7x, 96 MiB on v5e/v6e)."""
    cap = 128 << 20
    try:
        info = pltpu.get_tpu_info()
        cap = int(getattr(info, "vmem_capacity_bytes", cap))
    except Exception:
        pass
    return cap * 3 // 4


_VMEM_BUDGET = _vmem_budget_bytes()


def _default_act_dtype():
    """bf16 tanh on chips with a bf16 VPU/EUP (v6e/v7x); f32 on v5e."""
    try:
        kind = jax.devices()[0].device_kind.lower()
    except Exception:
        return jnp.float32
    return jnp.float32 if "v5" in kind else jnp.bfloat16


_ACT_DTYPE = _default_act_dtype()


def _compute_kappa(t):
    """Scalar kappa(t); plain-JAX glue (scalar math, not the hot path)."""
    damping = jnp.exp(-GAMMA * t)
    oscillation = jnp.sin(2.0 * np.pi * t * ALPHA)
    modulation = 1.0 + BETA * jnp.cos(PHI * t)
    return KAPPA_0 * damping * oscillation * modulation


# --- Pallas kernel: fused Linear -> tanh(kappa*.) -> Linear ------------------
def _qdtnn_kernel(kappa_ref, x_ref, w1_ref, b1_ref, w2_ref, b2_ref, o_ref):
    kappa = kappa_ref[0]                                 # scalar from SMEM
    # x may arrive f32 (already aligned case); cast is a VPU op under MXU slack.
    xt = x_ref[...].astype(jnp.bfloat16)
    # hidden layer: (TB, In_p)bf16 @ (In_p, H_p)bf16 -> f32, + (1, H_p)f32
    h = jnp.dot(xt, w1_ref[...],
                preferred_element_type=jnp.float32) + b1_ref[...]
    # QDT activation (bf16 on v6e/v7x, f32 on v5e)
    a = jnp.tanh((kappa * h).astype(_ACT_DTYPE)).astype(jnp.bfloat16)
    # output layer: (TB, H_p)bf16 @ (H_p, O_p)bf16 -> f32, + (1, O_p)f32
    o_ref[...] = (jnp.dot(a, w2_ref[...],
                          preferred_element_type=jnp.float32)
                  + b2_ref[...]).astype(o_ref.dtype)


def _pick_batch_tile(batch, in_p, h_p, out_p, vmem_budget):
    """Largest batch tile that fits the VMEM budget, >=2 tiles when possible."""
    tb = min(_MAX_BATCH_TILE, _round_up(batch, _BF16_SUBLANE))
    # v7x megacore: make sure the "parallel" batch axis has >= 2 grid steps
    # (one per TensorCore) whenever the batch is big enough to split.
    if batch > _BF16_SUBLANE:
        tb = min(tb, _round_up((batch + 1) // 2, _BF16_SUBLANE))

    def per_step_bytes(t):
        return (2 * t * in_p * 4                      # x tiles (f32 worst case, 2 bufs)
                + 2 * t * out_p * 4                   # out tiles (f32, 2 bufs)
                + (in_p * h_p + h_p * out_p) * 2      # resident weights (single-buffered)
                + (h_p + out_p) * 4                   # resident biases
                + 2 * t * h_p * 4)                    # h / a intermediates headroom

    while tb > _BF16_SUBLANE and 2 * per_step_bytes(tb) > vmem_budget:
        tb = max(_BF16_SUBLANE, _round_up(tb // 2, _BF16_SUBLANE))
    return tb


# --- parameter preparation (one-time; removes per-call weight pad/cast) -----
def prepare_params(params):
    """Pad weights/biases to lane-aligned shapes and cast weights to bf16 once."""
    in_f, hidden = params["w1"].shape
    out_f = params["w2"].shape[1]
    in_p = _round_up(in_f, _LANE)
    h_p = _round_up(hidden, _LANE)
    out_p = _round_up(out_f, _LANE)
    w1 = jnp.pad(params["w1"], ((0, in_p - in_f), (0, h_p - hidden))
                 ).astype(jnp.bfloat16)
    b1 = jnp.pad(params["b1"], (0, h_p - hidden)).reshape(1, h_p).astype(jnp.float32)
    w2 = jnp.pad(params["w2"], ((0, h_p - hidden), (0, out_p - out_f))
                 ).astype(jnp.bfloat16)
    b2 = jnp.pad(params["b2"], (0, out_p - out_f)).reshape(1, out_p).astype(jnp.float32)
    return {"w1": w1, "b1": b1, "w2": w2, "b2": b2, "out_features": out_f}


# --- forward ----------------------------------------------------------------
@functools.partial(jax.jit, static_argnames=("out_features", "time_steps"))
def _forward_impl(x, step, w1p, b1p, w2p, b2p, *, out_features, time_steps=100):
    batch, in_f = x.shape
    in_p, h_p = w1p.shape
    out_p = w2p.shape[1]

    # t = time[step % time_steps] with time = arange(time_steps).float()
    t = jnp.asarray(step % time_steps, dtype=jnp.float32)
    kappa = _compute_kappa(t).reshape((1,)).astype(jnp.float32)

    vmem_budget = _VMEM_BUDGET
    tb = _pick_batch_tile(batch, in_p, h_p, out_p, vmem_budget)
    b_pad = _round_up(batch, tb)
    n_tiles = b_pad // tb

    # Residency check: weights must fit (single-buffered) well inside VMEM.
    weight_bytes = (in_p * h_p + h_p * out_p) * 2 + (h_p + out_p) * 4
    if weight_bytes > vmem_budget // 2:
        # TODO(synk): add a K-reduction grid axis with a VMEM accumulator once
        # hidden sizes outgrow the fully-resident-weights regime.
        raise NotImplementedError(
            "hidden size too large for fully-resident weights on this chip")

    # Feed x straight in f32 when already lane/tile aligned (skips a wrapper
    # pad+cast HBM pass); otherwise pad once and cast to bf16 in the wrapper.
    if in_f == in_p and batch == b_pad:
        x_in = x
    else:
        x_in = jnp.pad(x, ((0, b_pad - batch), (0, in_p - in_f))
                       ).astype(jnp.bfloat16)
    x_bytes = jnp.dtype(x_in.dtype).itemsize

    # VMEM budget for this call (double-buffered x/out, single-buffered weights)
    vmem_est = (2 * tb * in_p * x_bytes
                + 2 * tb * out_p * 4
                + weight_bytes
                + 2 * tb * h_p * 4)
    vmem_limit = int(min(max(2 * vmem_est, 8 << 20), vmem_budget))

    flops = 2 * b_pad * (in_p * h_p + h_p * out_p)
    bytes_accessed = (b_pad * in_p * x_bytes + weight_bytes + b_pad * out_p * 4)

    grid_spec = pltpu.PrefetchScalarGridSpec(
        num_scalar_prefetch=0,
        grid=(n_tiles,),
        in_specs=[
            pl.BlockSpec(memory_space=pltpu.SMEM),               # kappa scalar
            pl.BlockSpec((tb, in_p), lambda i: (i, 0)),          # x batch tile
            pl.BlockSpec((in_p, h_p), lambda i: (0, 0),          # W1 (resident,
                         pipeline_mode=pl.Buffered(1)),          #  single-buffered)
            pl.BlockSpec((1, h_p), lambda i: (0, 0),
                         pipeline_mode=pl.Buffered(1)),          # b1
            pl.BlockSpec((h_p, out_p), lambda i: (0, 0),
                         pipeline_mode=pl.Buffered(1)),          # W2
            pl.BlockSpec((1, out_p), lambda i: (0, 0),
                         pipeline_mode=pl.Buffered(1)),          # b2
        ],
        out_specs=pl.BlockSpec((tb, out_p), lambda i: (i, 0)),
    )

    y_pad = pl.pallas_call(
        _qdtnn_kernel,
        out_shape=jax.ShapeDtypeStruct((b_pad, out_p), jnp.float32),
        grid_spec=grid_spec,
        compiler_params=pltpu.CompilerParams(
            dimension_semantics=("parallel",),
            vmem_limit_bytes=vmem_limit,
        ),
        cost_estimate=pl.CostEstimate(
            flops=int(flops),
            transcendentals=int(b_pad * h_p),       # tanh
            bytes_accessed=int(bytes_accessed),
        ),
    )(kappa, x_in, w1p, b1p, w2p, b2p)

    # strip padding only when some was added
    if batch == b_pad and out_features == out_p:
        return y_pad
    return y_pad[:batch, :out_features]


def dynamic_qdtnn_forward(x, step, prepared, time_steps=100):
    """Forward pass of DynamicQDTNN using one-time-prepared (padded bf16) params."""
    return _forward_impl(x, step, prepared["w1"], prepared["b1"],
                         prepared["w2"], prepared["b2"],
                         out_features=prepared["out_features"],
                         time_steps=time_steps)


# --- init & pure-JAX reference ----------------------------------------------
def _init_params(key, input_size, hidden_size, output_size):
    """Deterministic init mimicking nn.Linear (uniform +/- 1/sqrt(fan_in))."""
    k1, k2, k3, k4 = jax.random.split(key, 4)
    lim1 = 1.0 / np.sqrt(input_size)
    lim2 = 1.0 / np.sqrt(hidden_size)
    return {
        "w1": jax.random.uniform(k1, (input_size, hidden_size),
                                 jnp.float32, -lim1, lim1),
        "b1": jax.random.uniform(k2, (hidden_size,), jnp.float32, -lim1, lim1),
        "w2": jax.random.uniform(k3, (hidden_size, output_size),
                                 jnp.float32, -lim2, lim2),
        "b2": jax.random.uniform(k4, (output_size,), jnp.float32, -lim2, lim2),
    }


def _reference_forward(x, step, params, time_steps=100):
    """Pure-JAX f32 reference mirroring the PyTorch module."""
    t = jnp.asarray(step % time_steps, dtype=jnp.float32)
    kappa = _compute_kappa(t)
    h = x @ params["w1"] + params["b1"]
    a = jnp.tanh(kappa * h)
    return a @ params["w2"] + params["b2"]


if __name__ == "__main__":
    batch = 2
    input_size = 16
    hidden_size = 32
    output_size = 8
    time_steps = 100
    step = 7

    key = jax.random.PRNGKey(0)
    kx, kp = jax.random.split(key)
    x = jax.random.normal(kx, (batch, input_size), dtype=jnp.float32)
    params = _init_params(kp, input_size, hidden_size, output_size)

    prepared = prepare_params(params)   # one-time pad + bf16 cast of the weights
    y = dynamic_qdtnn_forward(x, jnp.int32(step), prepared, time_steps=time_steps)
    y = jax.block_until_ready(y)

    # f32 reference; kernel uses bf16 weights/activations with f32 accumulation,
    # so compare with a mixed-precision tolerance (intentional deviation).
    y_ref = _reference_forward(x, step, params, time_steps=time_steps)
    np.testing.assert_allclose(np.asarray(y), np.asarray(y_ref),
                               rtol=1e-2, atol=1e-2)

    print("KERNEL_OK")
</pallas_src>

<mosaic_0001>
module attributes {stable_mosaic.version = 11 : i64} {
  func.func @_qdtnn_kernel(%arg0: i32, %arg1: memref<1xf32, #tpu.memory_space<smem>>, %arg2: memref<16x128xbf16, #tpu.memory_space<vmem>>, %arg3: memref<128x128xbf16, #tpu.memory_space<vmem>>, %arg4: memref<1x128xf32, #tpu.memory_space<vmem>>, %arg5: memref<128x128xbf16, #tpu.memory_space<vmem>>, %arg6: memref<1x128xf32, #tpu.memory_space<vmem>>, %arg7: memref<16x128xf32, #tpu.memory_space<vmem>>) attributes {dimension_semantics = [#tpu.dimension_semantics<parallel>], iteration_bounds = array<i64: 1>, scalar_prefetch = 0 : i64, scratch_operands = 0 : i64, tpu.core_type = #tpu.core_type<tc>, window_params = [{transform_indices = @transform_0, window_bounds = array<i64: 1>}, {transform_indices = @transform_1, window_bounds = array<i64: 16, 128>}, {pipeline_mode = #tpu.pipeline_mode<synchronous>, transform_indices = @transform_2, window_bounds = array<i64: 128, 128>}, {pipeline_mode = #tpu.pipeline_mode<synchronous>, transform_indices = @transform_3, window_bounds = array<i64: 1, 128>}, {pipeline_mode = #tpu.pipeline_mode<synchronous>, transform_indices = @transform_4, window_bounds = array<i64: 128, 128>}, {pipeline_mode = #tpu.pipeline_mode<synchronous>, transform_indices = @transform_5, window_bounds = array<i64: 1, 128>}, {transform_indices = @transform_6, window_bounds = array<i64: 16, 128>}]} {
    %c0 = arith.constant 0 : index
    %0 = memref.load %arg1[%c0] : memref<1xf32, #tpu.memory_space<smem>>
    %c0_0 = arith.constant 0 : index
    %c0_1 = arith.constant 0 : index
    %1 = vector.load %arg2[%c0_0, %c0_1] : memref<16x128xbf16, #tpu.memory_space<vmem>>, vector<16x128xbf16>
    %c0_2 = arith.constant 0 : index
    %c0_3 = arith.constant 0 : index
    %2 = vector.load %arg3[%c0_2, %c0_3] : memref<128x128xbf16, #tpu.memory_space<vmem>>, vector<128x128xbf16>
    %cst = arith.constant dense<0.000000e+00> : vector<16x128xf32>
    %3 = tpu.matmul %1, %2, %cst {dimension_numbers = #tpu.dot_dimension_numbers<[1], [0], [0], [1], [0, 0, 1, 1], [], []>} : vector<16x128xbf16>, vector<128x128xbf16>, vector<16x128xf32> -> vector<16x128xf32>
    %c0_4 = arith.constant 0 : index
    %c0_5 = arith.constant 0 : index
    %4 = vector.load %arg4[%c0_4, %c0_5] : memref<1x128xf32, #tpu.memory_space<vmem>>, vector<1x128xf32>
    %5 = vector.broadcast %4 : vector<1x128xf32> to vector<16x128xf32>
    %6 = arith.addf %3, %5 : vector<16x128xf32>
    %7 = vector.broadcast %0 : f32 to vector<16x128xf32>
    %8 = arith.mulf %7, %6 : vector<16x128xf32>
    %9 = arith.truncf %8 : vector<16x128xf32> to vector<16x128xbf16>
    %10 = math.tanh %9 : vector<16x128xbf16>
    %c0_6 = arith.constant 0 : index
    %c0_7 = arith.constant 0 : index
    %11 = vector.load %arg5[%c0_6, %c0_7] : memref<128x128xbf16, #tpu.memory_space<vmem>>, vector<128x128xbf16>
    %cst_8 = arith.constant dense<0.000000e+00> : vector<16x128xf32>
    %12 = tpu.matmul %10, %11, %cst_8 {dimension_numbers = #tpu.dot_dimension_numbers<[1], [0], [0], [1], [0, 0, 1, 1], [], []>} : vector<16x128xbf16>, vector<128x128xbf16>, vector<16x128xf32> -> vector<16x128xf32>
    %c0_9 = arith.constant 0 : index
    %c0_10 = arith.constant 0 : index
    %13 = vector.load %arg6[%c0_9, %c0_10] : memref<1x128xf32, #tpu.memory_space<vmem>>, vector<1x128xf32>
    %14 = vector.broadcast %13 : vector<1x128xf32> to vector<16x128xf32>
    %15 = arith.addf %12, %14 : vector<16x128xf32>
    %c0_11 = arith.constant 0 : index
    %c0_12 = arith.constant 0 : index
    %16 = vector.load %arg7[%c0_11, %c0_12] : memref<16x128xf32, #tpu.memory_space<vmem>>, vector<16x128xf32>
    tpu.vector_store %arg7[%c0_11, %c0_12], %15 {strides = array<i32>} : memref<16x128xf32, #tpu.memory_space<vmem>>, vector<16x128xf32>,
    return
  }
  func.func @transform_0(%arg0: i32) -> i32 {
    %c0_i32 = arith.constant 0 : i32
    %c0_i32_0 = arith.constant 0 : i32
    return %c0_i32 : i32
  }
  func.func @transform_1(%arg0: i32) -> (i32, i32) {
    %c0_i32 = arith.constant 0 : i32
    %c0_i32_0 = arith.constant 0 : i32
    return %arg0, %c0_i32 : i32, i32
  }
  func.func @transform_2(%arg0: i32) -> (i32, i32) {
    %c0_i32 = arith.constant 0 : i32
    %c0_i32_0 = arith.constant 0 : i32
    %c0_i32_1 = arith.constant 0 : i32
    return %c0_i32, %c0_i32_0 : i32, i32
  }
  func.func @transform_3(%arg0: i32) -> (i32, i32) {
    %c0_i32 = arith.constant 0 : i32
    %c0_i32_0 = arith.constant 0 : i32
    %c0_i32_1 = arith.constant 0 : i32
    return %c0_i32, %c0_i32_0 : i32, i32
  }
  func.func @transform_4(%arg0: i32) -> (i32, i32) {
    %c0_i32 = arith.constant 0 : i32
    %c0_i32_0 = arith.constant 0 : i32
    %c0_i32_1 = arith.constant 0 : i32
    return %c0_i32, %c0_i32_0 : i32, i32
  }
  func.func @transform_5(%arg0: i32) -> (i32, i32) {
    %c0_i32 = arith.constant 0 : i32
    %c0_i32_0 = arith.constant 0 : i32
    %c0_i32_1 = arith.constant 0 : i32
    return %c0_i32, %c0_i32_0 : i32, i32
  }
  func.func @transform_6(%arg0: i32) -> (i32, i32) {
    %c0_i32 = arith.constant 0 : i32
    %c0_i32_0 = arith.constant 0 : i32
    return %arg0, %c0_i32 : i32, i32
  }
}

</mosaic_0001>

<bundles_post_ra>
// kernel: _forward_impl.1
= control target key start
LH: loop header
LB: loop body
LE: loop exit
PB: predicated region body
PF: predicated region fallthrough
CT: control target
= control target key end

     0   :  { %12 = vsyncpa [#allocation4], 0  ;;  %s409_s21 = smov [#allocation3]   ;;  %s503_s0 = inlined_call_operand.<no memory space> [shape: f32[1], index: 0, kind: input, shape index: {}]   ;;  %s504_s1 = inlined_call_operand.vmem [shape: bf16[16,128], index: 1, kind: input, shape index: {}]   ;;  %s505_s2 = inlined_call_operand.vmem [shape: bf16[128,128], index: 2, kind: input, shape index: {}]   ;;  %s506_s3 = inlined_call_operand.vmem [shape: f32[1,128], index: 3, kind: input, shape index: {}]   ;;  %s507_s4 = inlined_call_operand.hbm [shape: bf16[128,128], index: 4, kind: input, shape index: {}]   ;;  %s508_s5 = inlined_call_operand.vmem [shape: f32[1,128], index: 5, kind: input, shape index: {}]   ;;  %s509_s6 = inlined_call_operand.vmem [shape: f32[16,128], index: 6, kind: output, shape index: {}]  }
   0x1   :  { %s26_s22 = sshll.u32 %s409_s21, 4  ;;  %s385_s25 = scalar_lea.hbm %s507_s4, 1024  ;;  %s27_s22 = int_to_ptr.vmem [resolvable:$true] %s26_s22 }
   0x2   :  { %p386_p0 = scmp.ne.s32.totalorder %s507_s4, %s385_s25  ;;  %p389_p1 = scmp.lt.u32.totalorder %s385_s25, %s507_s4 }
   0x4   :  { %p391_p2 = pnand %p389_p1, %p386_p0 }
   0x6   :  { %394 = shalt.err (!%p391_p2)
}
   0x7   :  { %s395_s30 = scalar_lea.vmem %s27_s22, 1024  ;;  %p400_p4 = scmp.lt.s32.totalorder %s27_s22, %s27_s22 }
   0x8   :  { %p396_p3 = scmp.ne.s32.totalorder %s27_s22, %s395_s30  ;;  %p401_p5 = scmp.lt.s32.totalorder %s395_s30, %s395_s30 }
   0xa   :  { %p402_p6 = por %p401_p5, %p400_p4 }
   0xc   :  { %p403_p7 = pnand %p402_p6, %p396_p3 }
   0xe   :  { %406 = shalt.err (!%p403_p7)
}
   0xf   :  { %s410_s7 = smov 64   ;;  %s411_s8 = smov 4  }
  0x10   :  { %32 = dma.hbm_to_vmem [thread:$0]  %s507_s4, 1024, %s27_s22, [#allocation4], %s410_s7, %s410_s7, %s411_s8  }
  0x11   :  { %407 = dma.done.wait [#allocation4], 1024  }
  0x12   :  { %408 = vsyncadd [#allocation4], 4294966272  ;;  %v412_v0 = vmov 0.0   ;;  %vm413_vm0 = vmmov 0   ;;  %v366_v1 = vld [vmem:[%s505_s2] sm:$0xff]   ;;  %v367_v2 = vld [vmem:[%s505_s2 + $0x8] sm:$0xff]   ;;  %v160_v22 = vstv %s503_s0 }
  0x13   :  { %321 = vmatprep.subr.bf16.mxu0 %v412_v0  ;;  %337 = vmatprep.mubr.msk.bf16.mxu0 %vm413_vm0, %v412_v0  ;;  %v368_v3 = vld [vmem:[%s505_s2 + $0x10] sm:$0xff]   ;;  %v375_v4 = vld [vmem:[#allocation3] sm:$0xff]   ;;  %v369_v5 = vld [vmem:[%s505_s2 + $0x18] sm:$0xff]  }
  0x14   :  { %341 = vmatprep.subr.bf16.mxu1 %v412_v0  ;;  %357 = vmatprep.mubr.msk.bf16.mxu1 %vm413_vm0, %v412_v0  ;;  %v376_v6 = vld [vmem:[#allocation3 + $0x8] sm:$0xff]   ;;  %v370_v7 = vld [vmem:[%s505_s2 + $0x20] sm:$0xff]   ;;  %v377_v8 = vld [vmem:[#allocation3 + $0x10] sm:$0xff]  }
  0x15   :  { %322 = vmatpush3.bf16.msra.mxu0 %v366_v1  ;;  %342 = vmatpush3.bf16.msra.mxu1 %v375_v4  ;;  %v371_v9 = vld [vmem:[%s505_s2 + $0x28] sm:$0xff]   ;;  %v372_v10 = vld [vmem:[%s505_s2 + $0x30] sm:$0xff]   ;;  %v373_v11 = vld [vmem:[%s505_s2 + $0x38] sm:$0xff]  }
  0x16   :  { %323 = vmatprep.subr.bf16.mxu0 %v412_v0  ;;  %343 = vmatprep.subr.bf16.mxu1 %v412_v0  ;;  %v374_v12 = vld [vmem:[%s504_s1] sm:$0xff]   ;;  %v378_v13 = vld [vmem:[#allocation3 + $0x18] sm:$0xff]   ;;  %v380_v15 = vld [vmem:[#allocation3 + $0x28] sm:$0xff]  }
  0x17   :  { %v379_v14 = vld [vmem:[#allocation3 + $0x20] sm:$0xff]   ;;  %v381_v16 = vld [vmem:[#allocation3 + $0x30] sm:$0xff]   ;;  %v382_v17 = vld [vmem:[#allocation3 + $0x38] sm:$0xff]  }
  0x18   :  { %v284_v18 = vld [vmem:[%s506_s3] ss:$0 sm:$0xff] }
  0x19   :  { %324 = vmatpush3.bf16.msra.mxu0 %v367_v2  ;;  %344 = vmatpush3.bf16.msra.mxu1 %v376_v6  ;;  %v294_v30 = vld [vmem:[%s508_s5] ss:$0 sm:$0xff] }
  0x1a   :  { %325 = vmatprep.subr.bf16.mxu0 %v412_v0  ;;  %345 = vmatprep.subr.bf16.mxu1 %v412_v0 }
  0x1d   :  { %326 = vmatpush3.bf16.msra.mxu0 %v368_v3  ;;  %346 = vmatpush3.bf16.msra.mxu1 %v377_v8 }
  0x1e   :  { %327 = vmatprep.subr.bf16.mxu0 %v412_v0  ;;  %347 = vmatprep.subr.bf16.mxu1 %v412_v0 }
  0x21   :  { %328 = vmatpush3.bf16.msra.mxu0 %v369_v5  ;;  %348 = vmatpush3.bf16.msra.mxu1 %v378_v13 }
  0x22   :  { %329 = vmatprep.subr.bf16.mxu0 %v412_v0  ;;  %349 = vmatprep.subr.bf16.mxu1 %v412_v0 }
  0x25   :  { %330 = vmatpush3.bf16.msra.mxu0 %v370_v7  ;;  %350 = vmatpush3.bf16.msra.mxu1 %v379_v14 }
  0x26   :  { %331 = vmatprep.subr.bf16.mxu0 %v412_v0  ;;  %351 = vmatprep.subr.bf16.mxu1 %v412_v0 }
  0x29   :  { %332 = vmatpush3.bf16.msra.mxu0 %v371_v9  ;;  %352 = vmatpush3.bf16.msra.mxu1 %v380_v15 }
  0x2a   :  { %333 = vmatprep.subr.bf16.mxu0 %v412_v0  ;;  %353 = vmatprep.subr.bf16.mxu1 %v412_v0 }
  0x2d   :  { %334 = vmatpush3.bf16.msra.mxu0 %v372_v10  ;;  %354 = vmatpush3.bf16.msra.mxu1 %v381_v16 }
  0x2e   :  { %335 = vmatprep.subr.bf16.mxu0 %v412_v0  ;;  %355 = vmatprep.subr.bf16.mxu1 %v412_v0 }
  0x31   :  { %336 = vmatpush3.bf16.msra.mxu0 %v373_v11  ;;  %356 = vmatpush3.bf16.msra.mxu1 %v382_v17 }
  0x34   :  { %338 = vmatmul.mubr.bf16.vlgmr.msra.gmra.mrb[0].mxu0 %v374_v12 }
 0x107   :  { %v153_v19 = vpop.f32.mrb[0].mxu0 }
 0x108   :  { %v154_v20 = vadd.f32 %v284_v18, %v153_v19  ;;  %v339_v21 = vpop.f32.mrb[1].mxu0 }
 0x109   :  { %v156_v23 = vpop.f32.mrb[2].mxu0 }
 0x10a   :  { %v157_v24 = vadd.f32 %v284_v18, %v156_v23  ;;  %v340_v25 = vpop.f32.mrb[3].mxu0  ;;  %v161_v26 = vmul.f32 %v160_v22, %v154_v20 }
 0x10c   :  { %v162_v27 = vmul.f32 %v160_v22, %v157_v24 }
 0x10e   :  { %v163_v28 = vpack.c.bf16 %v162_v27, %v161_v26 }
 0x110   :  { %383 = vtanh.bf16 %v163_v28 }
 0x11b   :  { %v384_v29 = vpop.eup %383 }
 0x11c   :  { %358 = vmatmul.mubr.bf16.vlgmr.msra.gmra.mrb[0].mxu1 %v384_v29 }
 0x1ef   :  { %v270_v31 = vpop.f32.mrb[0].mxu1 }
 0x1f0   :  { %v271_v32 = vadd.f32 %v294_v30, %v270_v31  ;;  %v359_v33 = vpop.f32.mrb[1].mxu1 }
 0x1f1   :  { %v273_v34 = vpop.f32.mrb[2].mxu1 }
 0x1f2   :  { %277 = vst [vmem:[%s509_s6] sm:$0xff] %v271_v32  ;;  %v274_v35 = vadd.f32 %v294_v30, %v273_v34  ;;  %v360_v36 = vpop.f32.mrb[3].mxu1 }
 0x1f4   :  { %278 = vst [vmem:[%s509_s6 + $0x8] sm:$0xff] %v274_v35 }
 0x1f5   :  { %283 = vsyncpa [#allocation4], 1 }

</bundles_post_ra>
